<compile_context>
chip_gen: v7x
topology: tpu7x:2x2x1
jax: 0.10.0
libtpu: 0.0.40
codegen_flags: <defaults>
</compile_context>

<pallas_src>
import jax
import jax.numpy as jnp
from jax import lax
from jax.experimental import pallas as pl
from jax.experimental.pallas import tpu as pltpu

_LANES = 128       # vreg lane width / fused hidden width
_IN_LANES = 8      # x (B, 3) padded to 8 feature lanes -> fc1 runs on the MXU
_OUT_LANES = 8     # output slab columns: [p0, p1, value, 0, 0, 0, 0, 0]
_TB_MAX = 2048     # max batch-tile rows (tiny VMEM footprint even on v7x)
_MIN_SPLIT = 256   # batches >= this always get >=2 grid steps (v7x has 2 TCs)

# Packed weight-slab row layout (all blocks sublane-aligned, full 128 lanes).
_W1_ROWS = (0, 8)
_W2_ROWS = (8, 136)
_W3_ROWS = (136, 264)
_W4_ROWS = (264, 392)
_W_TOTAL_ROWS = 392


def _round_up(n: int, m: int) -> int:
    return ((n + m - 1) // m) * m


def _fused_kernel(x_ref, w_ref, b_ref, o_ref):
    """One batch tile of the weight-fused policy+value forward pass."""
    x = x_ref[...]                                   # (TB, 8)

    w1 = w_ref[_W1_ROWS[0]:_W1_ROWS[1], :]           # (8, 128)
    w2 = w_ref[_W2_ROWS[0]:_W2_ROWS[1], :]           # (128, 128)
    w3 = w_ref[_W3_ROWS[0]:_W3_ROWS[1], :]           # (128, 128)
    w4 = w_ref[_W4_ROWS[0]:_W4_ROWS[1], :]           # (128, 128)
    b1 = b_ref[0:1, :]
    b2 = b_ref[1:2, :]
    b3 = b_ref[2:3, :]
    b4 = b_ref[3:4, :]

    # fc1..fc3: full 128-lane MXU matmuls (policy trunk in lanes 0:half,
    # value trunk in the other block of the block-diagonal weights).
    h = jnp.maximum(jnp.dot(x, w1, preferred_element_type=jnp.float32) + b1, 0.0)
    h = jnp.maximum(jnp.dot(h, w2, preferred_element_type=jnp.float32) + b2, 0.0)
    h = jnp.maximum(jnp.dot(h, w3, preferred_element_type=jnp.float32) + b3, 0.0)
    # fc4 heads: result lanes are already [l0, l1, v, 0, ..., 0].
    out = jnp.dot(h, w4, preferred_element_type=jnp.float32) + b4    # (TB, 128)

    # softmax(dim=1) over 2 classes == sigmoid of the logit difference:
    # exact, no cross-lane reductions, exp lands on the EUP slot.
    l0 = out[:, 0:1]
    l1 = out[:, 1:2]
    p0 = 1.0 / (1.0 + jnp.exp(l1 - l0))               # (TB, 1)
    p1 = 1.0 - p0

    # Only lanes 0-1 need overwriting; lanes 2.. are already [value, 0, ...].
    head = out[:, 0:_OUT_LANES]                       # (TB, 8)
    col = lax.broadcasted_iota(jnp.int32, head.shape, dimension=1)
    o_ref[...] = jnp.where(col == 0, p0, jnp.where(col == 1, p1, head))


def pack_actor_critic_params(pol_params, val_params):
    """Pack both networks' weights into one (392,128) slab + one (8,128) bias slab."""
    f32 = jnp.float32

    w1 = jnp.zeros((8, _LANES), f32)
    w1 = w1.at[0:3, 0:64].set(pol_params["w1"]).at[0:3, 64:128].set(val_params["w1"])

    w2 = jnp.zeros((_LANES, _LANES), f32)
    w2 = w2.at[0:64, 0:16].set(pol_params["w2"]).at[64:128, 16:32].set(val_params["w2"])

    w3 = jnp.zeros((_LANES, _LANES), f32)
    w3 = w3.at[0:16, 0:32].set(pol_params["w3"]).at[16:32, 32:64].set(val_params["w3"])

    w4 = jnp.zeros((_LANES, _LANES), f32)
    w4 = w4.at[0:32, 0:2].set(pol_params["w4"]).at[32:64, 2:3].set(val_params["w4"])

    w_slab = jnp.concatenate([w1, w2, w3, w4], axis=0)        # (392, 128)

    b_slab = jnp.zeros((8, _LANES), f32)
    b_slab = b_slab.at[0, 0:64].set(pol_params["b1"][0]).at[0, 64:128].set(val_params["b1"][0])
    b_slab = b_slab.at[1, 0:16].set(pol_params["b2"][0]).at[1, 16:32].set(val_params["b2"][0])
    b_slab = b_slab.at[2, 0:32].set(pol_params["b3"][0]).at[2, 32:64].set(val_params["b3"][0])
    b_slab = b_slab.at[3, 0:2].set(pol_params["b4"][0]).at[3, 2:3].set(val_params["b4"][0])
    return w_slab, b_slab


def actor_critic_forward(x, pol_params, val_params):
    """Fused forward of two `my_NN` instances (policyp=True and policyp=False).

    x: (B, 3) float32, weights stored pre-transposed as [in, out].
    Returns (policy_probs (B, 2), value (B, 1)) from a single pallas_call.
    """
    B = x.shape[0]
    b_pad8 = _round_up(B, 8)

    # Number of batch tiles: big enough tiles to amortize per-step overhead,
    # >=2 steps for large batches so both v7x TensorCores get work, and
    # padding bounded by ~8 rows per tile (not a full tile).
    n_tiles = -(-b_pad8 // _TB_MAX)
    if b_pad8 >= _MIN_SPLIT and n_tiles < 2:
        n_tiles = 2
    tb = _round_up(-(-b_pad8 // n_tiles), 8)
    b_pad = n_tiles * tb

    # Pad rows to b_pad and features 3 -> 8 so fc1 runs on the MXU.
    x8 = jnp.pad(x, ((0, b_pad - B), (0, _IN_LANES - x.shape[1])))

    w_slab, b_slab = pack_actor_critic_params(pol_params, val_params)

    x_spec = pl.BlockSpec((tb, _IN_LANES), lambda i: (i, 0))
    # Weights/biases: full-array blocks with constant index maps -> DMA'd once
    # and kept VMEM-resident across all batch tiles.
    w_spec = pl.BlockSpec((_W_TOTAL_ROWS, _LANES), lambda i: (0, 0))
    b_spec = pl.BlockSpec((8, _LANES), lambda i: (0, 0))
    out_spec = pl.BlockSpec((tb, _OUT_LANES), lambda i: (i, 0))

    out = pl.pallas_call(
        _fused_kernel,
        out_shape=jax.ShapeDtypeStruct((b_pad, _OUT_LANES), jnp.float32),
        grid_spec=pltpu.PrefetchScalarGridSpec(
            num_scalar_prefetch=0,
            grid=(n_tiles,),
            in_specs=[x_spec, w_spec, b_spec],
            out_specs=out_spec,
        ),
        compiler_params=pltpu.CompilerParams(
            # Batch tiles are independent: shard across both TCs on v7x.
            dimension_semantics=("parallel",),
        ),
    )(x8, w_slab, b_slab)

    return out[:B, 0:2], out[:B, 2:3]


def _zero_params(policyp: bool):
    """Zero-valued params with the exact shapes of my_NN(policyp)."""
    dims = [(3, 64), (64, 16), (16, 32), (32, 2 if policyp else 1)]
    params = {}
    for i, (fan_in, fan_out) in enumerate(dims, start=1):
        params[f"w{i}"] = jnp.zeros((fan_in, fan_out), jnp.float32)
        params[f"b{i}"] = jnp.zeros((1, fan_out), jnp.float32)
    return params


def my_nn_forward(x, params, policyp: bool):
    """Single-network forward matching `my_NN(policyp)` exactly.

    Reuses the fused kernel with a zero-weight dummy in the unused slot;
    with block-diagonal fusion the dummy branch adds no extra matmuls.
    """
    if policyp:
        pol, _ = actor_critic_forward(x, params, _zero_params(False))
        return pol
    _, val = actor_critic_forward(x, _zero_params(True), params)
    return val


def init_params(key, policyp: bool):
    """Deterministic init mirroring nn.Linear shapes (stored as [in, out])."""
    dims = [(3, 64), (64, 16), (16, 32), (32, 2 if policyp else 1)]
    params = {}
    for i, (fan_in, fan_out) in enumerate(dims, start=1):
        key, kw, kb = jax.random.split(key, 3)
        bound = 1.0 / jnp.sqrt(fan_in)  # torch.nn.Linear default init range
        params[f"w{i}"] = jax.random.uniform(
            kw, (fan_in, fan_out), jnp.float32, minval=-bound, maxval=bound)
        params[f"b{i}"] = jax.random.uniform(
            kb, (1, fan_out), jnp.float32, minval=-bound, maxval=bound)
    return params


def _reference_forward(x, params, policyp: bool):
    h = jnp.maximum(x @ params["w1"] + params["b1"], 0.0)
    h = jnp.maximum(h @ params["w2"] + params["b2"], 0.0)
    h = jnp.maximum(h @ params["w3"] + params["b3"], 0.0)
    logits = h @ params["w4"] + params["b4"]
    if policyp:
        return jax.nn.softmax(logits, axis=1)
    return logits


if __name__ == "__main__":
    key = jax.random.PRNGKey(0)
    key, kx, kp_pol, kp_val = jax.random.split(key, 4)

    B = 8
    x = jax.random.normal(kx, (B, 3), jnp.float32)

    pol_params = init_params(kp_pol, policyp=True)    # my_NN(policyp=True)
    val_params = init_params(kp_val, policyp=False)   # my_NN(policyp=False)

    # Fused actor-critic forward: ONE pallas_call computes both networks.
    pol_out, val_out = actor_critic_forward(x, pol_params, val_params)
    jax.block_until_ready((pol_out, val_out))

    pol_ref = _reference_forward(x, pol_params, policyp=True)
    val_ref = _reference_forward(x, val_params, policyp=False)
    assert pol_out.shape == (B, 2) and val_out.shape == (B, 1)
    assert jnp.allclose(pol_out, pol_ref, atol=1e-5, rtol=1e-5)
    assert jnp.allclose(val_out, val_ref, atol=1e-5, rtol=1e-5)
    assert jnp.allclose(jnp.sum(pol_out, axis=1), 1.0, atol=1e-5)

    # Single-network API (exercises the row-padding path: B=5 -> pad to 8).
    x_small = x[:5]
    pol_single = my_nn_forward(x_small, pol_params, policyp=True)
    val_single = my_nn_forward(x_small, val_params, policyp=False)
    jax.block_until_ready((pol_single, val_single))
    assert jnp.allclose(pol_single, pol_ref[:5], atol=1e-5, rtol=1e-5)
    assert jnp.allclose(val_single, val_ref[:5], atol=1e-5, rtol=1e-5)

    # Larger batch: exercises the >=2-tile grid (v7x two-core path) and the
    # bounded row padding (B=600 -> 2 tiles of 304, only 8 padded rows).
    key, kx2 = jax.random.split(key)
    Bl = 600
    x_large = jax.random.normal(kx2, (Bl, 3), jnp.float32)
    pol_l, val_l = actor_critic_forward(x_large, pol_params, val_params)
    jax.block_until_ready((pol_l, val_l))
    assert pol_l.shape == (Bl, 2) and val_l.shape == (Bl, 1)
    assert jnp.allclose(pol_l, _reference_forward(x_large, pol_params, True),
                        atol=1e-5, rtol=1e-5)
    assert jnp.allclose(val_l, _reference_forward(x_large, val_params, False),
                        atol=1e-5, rtol=1e-5)

    print("KERNEL_OK")
</pallas_src>

<mosaic_0001>
module attributes {stable_mosaic.version = 11 : i64} {
  func.func @_fused_kernel(%arg0: i32, %arg1: memref<8x8xf32, #tpu.memory_space<vmem>>, %arg2: memref<392x128xf32, #tpu.memory_space<vmem>>, %arg3: memref<8x128xf32, #tpu.memory_space<vmem>>, %arg4: memref<8x8xf32, #tpu.memory_space<vmem>>) attributes {dimension_semantics = [#tpu.dimension_semantics<parallel>], iteration_bounds = array<i64: 1>, scalar_prefetch = 0 : i64, scratch_operands = 0 : i64, tpu.core_type = #tpu.core_type<tc>, window_params = [{transform_indices = @transform_0, window_bounds = array<i64: 8, 8>}, {pipeline_mode = #tpu.pipeline_mode<synchronous>, transform_indices = @transform_1, window_bounds = array<i64: 392, 128>}, {pipeline_mode = #tpu.pipeline_mode<synchronous>, transform_indices = @transform_2, window_bounds = array<i64: 8, 128>}, {transform_indices = @transform_3, window_bounds = array<i64: 8, 8>}]} {
    %c0 = arith.constant 0 : index
    %c0_0 = arith.constant 0 : index
    %0 = vector.load %arg1[%c0, %c0_0] : memref<8x8xf32, #tpu.memory_space<vmem>>, vector<8x8xf32>
    %c0_1 = arith.constant 0 : index
    %c0_2 = arith.constant 0 : index
    %1 = vector.load %arg2[%c0_1, %c0_2] : memref<392x128xf32, #tpu.memory_space<vmem>>, vector<8x128xf32>
    %c8 = arith.constant 8 : index
    %c0_3 = arith.constant 0 : index
    %2 = vector.load %arg2[%c8, %c0_3] : memref<392x128xf32, #tpu.memory_space<vmem>>, vector<128x128xf32>
    %c136 = arith.constant 136 : index
    %c0_4 = arith.constant 0 : index
    %3 = vector.load %arg2[%c136, %c0_4] : memref<392x128xf32, #tpu.memory_space<vmem>>, vector<128x128xf32>
    %c264 = arith.constant 264 : index
    %c0_5 = arith.constant 0 : index
    %4 = vector.load %arg2[%c264, %c0_5] : memref<392x128xf32, #tpu.memory_space<vmem>>, vector<128x128xf32>
    %c0_6 = arith.constant 0 : index
    %c0_7 = arith.constant 0 : index
    %5 = vector.load %arg3[%c0_6, %c0_7] : memref<8x128xf32, #tpu.memory_space<vmem>>, vector<1x128xf32>
    %c1 = arith.constant 1 : index
    %c0_8 = arith.constant 0 : index
    %6 = vector.load %arg3[%c1, %c0_8] : memref<8x128xf32, #tpu.memory_space<vmem>>, vector<1x128xf32>
    %c2 = arith.constant 2 : index
    %c0_9 = arith.constant 0 : index
    %7 = vector.load %arg3[%c2, %c0_9] : memref<8x128xf32, #tpu.memory_space<vmem>>, vector<1x128xf32>
    %c3 = arith.constant 3 : index
    %c0_10 = arith.constant 0 : index
    %8 = vector.load %arg3[%c3, %c0_10] : memref<8x128xf32, #tpu.memory_space<vmem>>, vector<1x128xf32>
    %cst = arith.constant dense<0.000000e+00> : vector<8x128xf32>
    %9 = tpu.matmul %0, %1, %cst {dimension_numbers = #tpu.dot_dimension_numbers<[1], [0], [0], [1], [0, 0, 1, 1], [], []>} : vector<8x8xf32>, vector<8x128xf32>, vector<8x128xf32> -> vector<8x128xf32>
    %10 = vector.broadcast %5 : vector<1x128xf32> to vector<8x128xf32>
    %11 = arith.addf %9, %10 : vector<8x128xf32>
    %cst_11 = arith.constant 0.000000e+00 : f32
    %12 = vector.broadcast %cst_11 : f32 to vector<8x128xf32>
    %13 = arith.maximumf %11, %12 : vector<8x128xf32>
    %cst_12 = arith.constant dense<0.000000e+00> : vector<8x128xf32>
    %14 = tpu.matmul %13, %2, %cst_12 {dimension_numbers = #tpu.dot_dimension_numbers<[1], [0], [0], [1], [0, 0, 1, 1], [], []>} : vector<8x128xf32>, vector<128x128xf32>, vector<8x128xf32> -> vector<8x128xf32>
    %15 = vector.broadcast %6 : vector<1x128xf32> to vector<8x128xf32>
    %16 = arith.addf %14, %15 : vector<8x128xf32>
    %cst_13 = arith.constant 0.000000e+00 : f32
    %17 = vector.broadcast %cst_13 : f32 to vector<8x128xf32>
    %18 = arith.maximumf %16, %17 : vector<8x128xf32>
    %cst_14 = arith.constant dense<0.000000e+00> : vector<8x128xf32>
    %19 = tpu.matmul %18, %3, %cst_14 {dimension_numbers = #tpu.dot_dimension_numbers<[1], [0], [0], [1], [0, 0, 1, 1], [], []>} : vector<8x128xf32>, vector<128x128xf32>, vector<8x128xf32> -> vector<8x128xf32>
    %20 = vector.broadcast %7 : vector<1x128xf32> to vector<8x128xf32>
    %21 = arith.addf %19, %20 : vector<8x128xf32>
    %cst_15 = arith.constant 0.000000e+00 : f32
    %22 = vector.broadcast %cst_15 : f32 to vector<8x128xf32>
    %23 = arith.maximumf %21, %22 : vector<8x128xf32>
    %cst_16 = arith.constant dense<0.000000e+00> : vector<8x128xf32>
    %24 = tpu.matmul %23, %4, %cst_16 {dimension_numbers = #tpu.dot_dimension_numbers<[1], [0], [0], [1], [0, 0, 1, 1], [], []>} : vector<8x128xf32>, vector<128x128xf32>, vector<8x128xf32> -> vector<8x128xf32>
    %25 = vector.broadcast %8 : vector<1x128xf32> to vector<8x128xf32>
    %26 = arith.addf %24, %25 : vector<8x128xf32>
    %27 = vector.extract_strided_slice %26 {offsets = [0, 0], sizes = [8, 1], strides = [1, 1]} : vector<8x128xf32> to vector<8x1xf32>
    %28 = vector.extract_strided_slice %26 {offsets = [0, 1], sizes = [8, 1], strides = [1, 1]} : vector<8x128xf32> to vector<8x1xf32>
    %29 = arith.subf %28, %27 : vector<8x1xf32>
    %30 = math.exp %29 : vector<8x1xf32>
    %cst_17 = arith.constant 1.000000e+00 : f32
    %31 = vector.broadcast %cst_17 : f32 to vector<8x1xf32>
    %32 = arith.addf %31, %30 : vector<8x1xf32>
    %cst_18 = arith.constant 1.000000e+00 : f32
    %33 = vector.broadcast %cst_18 : f32 to vector<8x1xf32>
    %34 = arith.divf %33, %32 : vector<8x1xf32>
    %cst_19 = arith.constant 1.000000e+00 : f32
    %35 = vector.broadcast %cst_19 : f32 to vector<8x1xf32>
    %36 = arith.subf %35, %34 : vector<8x1xf32>
    %37 = vector.extract_strided_slice %26 {offsets = [0, 0], sizes = [8, 8], strides = [1, 1]} : vector<8x128xf32> to vector<8x8xf32>
    %38 = tpu.iota {dimensions = array<i32: 1>} : vector<8x8xi32>
    %c0_i32 = arith.constant 0 : i32
    %39 = vector.broadcast %c0_i32 : i32 to vector<8x8xi32>
    %40 = arith.cmpi eq, %38, %39 : vector<8x8xi32>
    %c1_i32 = arith.constant 1 : i32
    %41 = vector.broadcast %c1_i32 : i32 to vector<8x8xi32>
    %42 = arith.cmpi eq, %38, %41 : vector<8x8xi32>
    %43 = vector.shape_cast %36 : vector<8x1xf32> to vector<8x1xf32>
    %44 = vector.broadcast %43 : vector<8x1xf32> to vector<8x8xf32>
    %45 = arith.select %42, %44, %37 : vector<8x8xi1>, vector<8x8xf32>
    %46 = vector.shape_cast %34 : vector<8x1xf32> to vector<8x1xf32>
    %47 = vector.broadcast %46 : vector<8x1xf32> to vector<8x8xf32>
    %48 = arith.select %40, %47, %45 : vector<8x8xi1>, vector<8x8xf32>
    %c0_20 = arith.constant 0 : index
    %c0_21 = arith.constant 0 : index
    %49 = vector.load %arg4[%c0_20, %c0_21] : memref<8x8xf32, #tpu.memory_space<vmem>>, vector<8x8xf32>
    tpu.vector_store %arg4[%c0_20, %c0_21], %48 {strides = array<i32>} : memref<8x8xf32, #tpu.memory_space<vmem>>, vector<8x8xf32>,
    return
  }
  func.func @transform_0(%arg0: i32) -> (i32, i32) {
    %c0_i32 = arith.constant 0 : i32
    %c0_i32_0 = arith.constant 0 : i32
    return %arg0, %c0_i32 : i32, i32
  }
  func.func @transform_1(%arg0: i32) -> (i32, i32) {
    %c0_i32 = arith.constant 0 : i32
    %c0_i32_0 = arith.constant 0 : i32
    %c0_i32_1 = arith.constant 0 : i32
    return %c0_i32, %c0_i32_0 : i32, i32
  }
  func.func @transform_2(%arg0: i32) -> (i32, i32) {
    %c0_i32 = arith.constant 0 : i32
    %c0_i32_0 = arith.constant 0 : i32
    %c0_i32_1 = arith.constant 0 : i32
    return %c0_i32, %c0_i32_0 : i32, i32
  }
  func.func @transform_3(%arg0: i32) -> (i32, i32) {
    %c0_i32 = arith.constant 0 : i32
    %c0_i32_0 = arith.constant 0 : i32
    return %arg0, %c0_i32 : i32, i32
  }
}

</mosaic_0001>

<bundles_post_ra>
// kernel: tpu_custom_call.1
= control target key start
LH: loop header
LB: loop body
LE: loop exit
PB: predicated region body
PF: predicated region fallthrough
CT: control target
= control target key end

     0   :  { %8 = vsyncpa [#allocation3], 0  ;;  %s918_s0 = inlined_call_operand.hbm [shape: f32[8,8], index: 0, kind: input, shape index: {}]   ;;  %s919_s1 = inlined_call_operand.hbm [shape: f32[392,128], index: 1, kind: input, shape index: {}]   ;;  %s920_s2 = inlined_call_operand.hbm [shape: f32[8,128], index: 2, kind: input, shape index: {}]   ;;  %s921_s3 = inlined_call_operand.hbm [shape: f32[8,8], index: 3, kind: output, shape index: {}]  }
   0x1   :  { %9 = vsyncpa [#allocation6], 0 }
   0x2   :  { %10 = vsyncpa [#allocation4], 0  ;;  %s804_s12 = smov [#allocation5]   ;;  %s710_s16 = scalar_lea.hbm %s919_s1, 6272 }
   0x3   :  { %s26_s13 = sshll.u32 %s804_s12, 4  ;;  %p711_p0 = scmp.ne.s32.totalorder %s919_s1, %s710_s16  ;;  %s27_s13 = int_to_ptr.vmem [resolvable:$true] %s26_s13 }
   0x4   :  { %p714_p1 = scmp.lt.u32.totalorder %s710_s16, %s919_s1 }
   0x6   :  { %p716_p2 = pnand %p714_p1, %p711_p0 }
   0x8   :  { %719 = shalt.err (!%p716_p2)
}
   0x9   :  { %s720_s21 = scalar_lea.vmem %s27_s13, 6272  ;;  %p725_p4 = scmp.lt.s32.totalorder %s27_s13, %s27_s13 }
   0xa   :  { %p721_p3 = scmp.ne.s32.totalorder %s27_s13, %s720_s21  ;;  %p726_p5 = scmp.lt.s32.totalorder %s720_s21, %s720_s21 }
   0xc   :  { %p727_p6 = por %p726_p5, %p725_p4 }
   0xe   :  { %p728_p7 = pnand %p727_p6, %p721_p3 }
  0x10   :  { %731 = shalt.err (!%p728_p7)
}
  0x11   :  { %s805_s22 = smov 128   ;;  %s806_s23 = smov 8  }
  0x12   :  { %32 = dma.hbm_to_vmem [thread:$0]  %s919_s1, 6272, %s27_s13, [#allocation6], %s805_s22, %s805_s22, %s806_s23  }
  0x13   :  { %s807_s26 = smov [#allocation2]   ;;  %s808_s28 = smov [#allocation7]  }
  0x14   :  { %s17_s27 = sshll.u32 %s807_s26, 4  ;;  %s39_s29 = sshll.u32 %s808_s28, 4  ;;  %s18_s27 = int_to_ptr.vmem [resolvable:$true] %s17_s27  ;;  %s40_s29 = int_to_ptr.vmem [resolvable:$true] %s39_s29 }
  0x15   :  { %s732_s5 = scalar_lea.hbm %s918_s0, 128 }
  0x16   :  { %p733_p8 = scmp.ne.s32.totalorder %s918_s0, %s732_s5  ;;  %p736_p9 = scmp.lt.u32.totalorder %s732_s5, %s918_s0 }
  0x18   :  { %p738_p10 = pnand %p736_p9, %p733_p8 }
  0x1a   :  { %741 = shalt.err (!%p738_p10)
}
  0x1b   :  { %s742_s1 = scalar_lea.vmem %s18_s27, 128  ;;  %p747_p12 = scmp.lt.s32.totalorder %s18_s27, %s18_s27 }
  0x1c   :  { %p743_p11 = scmp.ne.s32.totalorder %s18_s27, %s742_s1  ;;  %p748_p13 = scmp.lt.s32.totalorder %s742_s1, %s742_s1 }
  0x1e   :  { %p749_p0 = por %p748_p13, %p747_p12 }
  0x20   :  { %p750_p1 = pnand %p749_p0, %p743_p11 }
  0x22   :  { %753 = shalt.err (!%p750_p1)
}
  0x23   :  { %20 = dma.hbm_to_vmem [thread:$0]  %s918_s0, 128, %s18_s27, [#allocation3]  }
  0x24   :  { %s754_s14 = scalar_lea.hbm %s920_s2, 128 }
  0x25   :  { %p755_p2 = scmp.ne.s32.totalorder %s920_s2, %s754_s14  ;;  %p758_p3 = scmp.lt.u32.totalorder %s754_s14, %s920_s2 }
  0x27   :  { %p760_p4 = pnand %p758_p3, %p755_p2 }
  0x29   :  { %763 = shalt.err (!%p760_p4)
}
  0x2a   :  { %s764_s19 = scalar_lea.vmem %s40_s29, 128  ;;  %p769_p6 = scmp.lt.s32.totalorder %s40_s29, %s40_s29 }
  0x2b   :  { %p765_p5 = scmp.ne.s32.totalorder %s40_s29, %s764_s19  ;;  %p770_p7 = scmp.lt.s32.totalorder %s764_s19, %s764_s19 }
  0x2d   :  { %p771_p8 = por %p770_p7, %p769_p6 }
  0x2f   :  { %p772_p9 = pnand %p771_p8, %p765_p5 }
  0x31   :  { %775 = shalt.err (!%p772_p9)
}
  0x32   :  { %42 = dma.hbm_to_vmem [thread:$0]  %s920_s2, 128, %s40_s29, [#allocation6]  }
  0x33   :  { %798 = dma.done.wait [#allocation3], 128  }
  0x34   :  { %799 = vsyncadd [#allocation3], 4294967168 }
  0x35   :  { %800 = dma.done.wait [#allocation6], 6400  }
  0x36   :  { %801 = vsyncadd [#allocation6], 4294960896  ;;  %v809_v0 = vmov 0.0   ;;  %vm810_vm0 = vmmov 0   ;;  %v811_v1 = vmov 0.0|0.0   ;;  %vm110_vm1 = vcmask 64512  }
  0x37   :  { %511 = vmatprep.subr.mxu0 %v809_v0  ;;  %513 = vmatprep.mubr.msk.f32.mxu0 %vm810_vm0, %v809_v0  ;;  %v53_v2 = vld [vmem:[#allocation5] sm:$0xff]  ;;  %v52_v3 = vld [vmem:[#allocation2] sm:$0xff]  ;;  %v54_v4 = vld [vmem:[#allocation5 + $0x8] sm:$0xff]  ;;  %s812_s2 = smov 1   ;;  %s814_s21 = smov [#allocation8]  }
  0x38   :  { %621 = vmatprep.subr.bf16.mxu1 %v811_v1  ;;  %548 = vmatprep.mubr.msk.f32.mxu1 %vm810_vm0, %v809_v0  ;;  %v55_v5 = vld [vmem:[#allocation5 + $0x10] sm:$0xff]  ;;  %v56_v6 = vld [vmem:[#allocation5 + $0x18] sm:$0xff]  ;;  %v57_v7 = vld [vmem:[#allocation5 + $0x20] sm:$0xff]  ;;  %s443_s22 = sshll.u32 %s814_s21, 4  ;;  %s444_s22 = int_to_ptr.vmem [resolvable:$true] %s443_s22 }
  0x39   :  { %512 = vmatpush3.msra.mxu0 %v53_v2  ;;  %v622_v8 = vpack.c.bf16 %v55_v5, %v54_v4  ;;  %v625_v9 = vpack.c.bf16 %v57_v7, %v56_v6  ;;  %v58_v10 = vld [vmem:[#allocation5 + $0x28] sm:$0xff]  ;;  %v59_v11 = vld [vmem:[#allocation5 + $0x30] sm:$0xff]  ;;  %v60_v13 = vld [vmem:[#allocation5 + $0x38] sm:$0xff]  ;;  %s776_s23 = scalar_lea.vmem %s444_s22, 128  ;;  %p781_p11 = scmp.lt.s32.totalorder %s444_s22, %s444_s22 }
  0x3a   :  { %514 = vmatmul.mubr.msk.f32.vlgmr.msra.gmra.mrb[0].mxu0 %vm110_vm1, %v52_v3  ;;  %645 = vmatprep.subr.bf16.mxu0 %v811_v1  ;;  %v628_v12 = vpack.c.bf16 %v59_v11, %v58_v10  ;;  %v61_v14 = vld [vmem:[#allocation5 + $0x40] sm:$0xff]  ;;  %v62_v16 = vld [vmem:[#allocation5 + $0x48] sm:$0xff]  ;;  %v63_v17 = vld [vmem:[#allocation5 + $0x50] sm:$0xff]  ;;  %p777_p10 = scmp.ne.s32.totalorder %s444_s22, %s776_s23  ;;  %p782_p12 = scmp.lt.s32.totalorder %s776_s23, %s776_s23 }
  0x3b   :  { %583 = vmatprep.mubr.msk.f32.mxu0 %vm810_vm0, %v809_v0  ;;  %623 = vmatpush3.bf16.msra.mxu1 %v622_v8  ;;  %v631_v15 = vpack.c.bf16 %v61_v14, %v60_v13  ;;  %v634_v18 = vpack.c.bf16 %v63_v17, %v62_v16  ;;  %v64_v19 = vld [vmem:[#allocation5 + $0x58] sm:$0xff]  ;;  %v65_v20 = vld [vmem:[#allocation5 + $0x60] sm:$0xff]  ;;  %v66_v22 = vld [vmem:[#allocation5 + $0x68] sm:$0xff] }
  0x3c   :  { %624 = vmatprep.subr.bf16.mxu1 %v811_v1  ;;  %v637_v21 = vpack.c.bf16 %v65_v20, %v64_v19  ;;  %v67_v23 = vld [vmem:[#allocation5 + $0x70] sm:$0xff]  ;;  %v68_v25 = vld [vmem:[#allocation5 + $0x78] sm:$0xff]  ;;  %v69_v26 = vld [vmem:[#allocation5 + $0x80] sm:$0xff]  ;;  %p783_p13 = por %p782_p12, %p781_p11 }
  0x3d   :  { %v640_v24 = vpack.c.bf16 %v67_v23, %v66_v22  ;;  %v643_v27 = vpack.c.bf16 %v69_v26, %v68_v25  ;;  %v70_v28 = vld [vmem:[#allocation5 + $0x88] sm:$0xff]  ;;  %v71_v29 = vld [vmem:[#allocation5 + $0x90] sm:$0xff]  ;;  %v72_v30 = vld [vmem:[#allocation5 + $0x98] sm:$0xff] }
  0x3e   :  { %v646_v31 = vpack.c.bf16 %v71_v29, %v70_v28  ;;  %v73_v32 = vld [vmem:[#allocation5 + $0xa0] sm:$0xff]  ;;  %v74_v34 = vld [vmem:[#allocation5 + $0xa8] sm:$0xff]  ;;  %v75_v35 = vld [vmem:[#allocation5 + $0xb0] sm:$0xff]  ;;  %p784_p0 = pnand %p783_p13, %p777_p10 }
  0x3f   :  { %626 = vmatpush3.bf16.msra.mxu1 %v625_v9  ;;  %v649_v33 = vpack.c.bf16 %v73_v32, %v72_v30  ;;  %v652_v36 = vpack.c.bf16 %v75_v35, %v74_v34  ;;  %v76_v37 = vld [vmem:[#allocation5 + $0xb8] sm:$0xff]  ;;  %v77_v38 = vld [vmem:[#allocation5 + $0xc0] sm:$0xff]  ;;  %v78_v40 = vld [vmem:[#allocation5 + $0xc8] sm:$0xff] }
  0x40   :  { %627 = vmatprep.subr.bf16.mxu1 %v811_v1  ;;  %647 = vmatpush3.bf16.msra.mxu0 %v646_v31  ;;  %v655_v39 = vpack.c.bf16 %v77_v38, %v76_v37  ;;  %v79_v41 = vld [vmem:[#allocation5 + $0xd0] sm:$0xff]  ;;  %v80_v43 = vld [vmem:[#allocation5 + $0xd8] sm:$0xff]  ;;  %v81_v44 = vld [vmem:[#allocation5 + $0xe0] sm:$0xff]  ;;  %v813_v31 = vmov 1  }
  0x41   :  { %648 = vmatprep.subr.bf16.mxu0 %v811_v1  ;;  %v658_v42 = vpack.c.bf16 %v79_v41, %v78_v40  ;;  %v661_v45 = vpack.c.bf16 %v81_v44, %v80_v43  ;;  %v82_v46 = vld [vmem:[#allocation5 + $0xe8] sm:$0xff]  ;;  %v83_v47 = vld [vmem:[#allocation5 + $0xf0] sm:$0xff]  ;;  %v84_v54 = vld [vmem:[#allocation5 + $0xf8] sm:$0xff]  ;;  %705 = vset.pattern.permute.xlu1 %v813_v31 }
  0x42   :  { %v664_v48 = vpack.c.bf16 %v83_v47, %v82_v46  ;;  %v453_v49 = vld [vmem:[#allocation7] ss:$0 sm:$0xff]  ;;  %v85_v55 = vld [vmem:[#allocation5 + $0x100] sm:$0xff]  ;;  %v87_v58 = vld [vmem:[#allocation5 + $0x110] sm:$0xff]  ;;  %704 = vset.pattern.permute.xlu0 %v813_v31 }
  0x43   :  { %629 = vmatpush3.bf16.msra.mxu1 %v628_v12  ;;  %v667_v56 = vpack.c.bf16 %v85_v55, %v84_v54  ;;  %v86_v57 = vld [vmem:[#allocation5 + $0x108] sm:$0xff]  ;;  %v88_v59 = vld [vmem:[#allocation5 + $0x118] sm:$0xff]  ;;  %v89_v61 = vld [vmem:[#allocation5 + $0x120] sm:$0xff] }
  0x44   :  { %630 = vmatprep.subr.bf16.mxu1 %v811_v1  ;;  %650 = vmatpush3.bf16.msra.mxu0 %v649_v33  ;;  %v670_v60 = vpack.c.bf16 %v87_v58, %v86_v57  ;;  %v673_v62 = vpack.c.bf16 %v89_v61, %v88_v59  ;;  %v90_v63 = vld [vmem:[#allocation5 + $0x128] sm:$0xff]  ;;  %v91_v2 = vld [vmem:[#allocation5 + $0x130] sm:$0xff]  ;;  %v93_v4 = vld [vmem:[#allocation5 + $0x140] sm:$0xff] }
  0x45   :  { %651 = vmatprep.subr.bf16.mxu0 %v811_v1  ;;  %v676_v3 = vpack.c.bf16 %v91_v2, %v90_v63  ;;  %v94_v6 = vld [vmem:[#allocation5 + $0x148] sm:$0xff]  ;;  %v95_v7 = vld [vmem:[#allocation5 + $0x150] sm:$0xff]  ;;  %v96_v9 = vld [vmem:[#allocation5 + $0x158] sm:$0xff] }
  0x46   :  { %v682_v8 = vpack.c.bf16 %v95_v7, %v94_v6  ;;  %v97_v10 = vld [vmem:[#allocation5 + $0x160] sm:$0xff]  ;;  %v98_v12 = vld [vmem:[#allocation5 + $0x168] sm:$0xff]  ;;  %v99_v13 = vld [vmem:[#allocation5 + $0x170] sm:$0xff] }
  0x47   :  { %632 = vmatpush3.bf16.msra.mxu1 %v631_v15  ;;  %v685_v11 = vpack.c.bf16 %v97_v10, %v96_v9  ;;  %v688_v14 = vpack.c.bf16 %v99_v13, %v98_v12  ;;  %v455_v15 = vld [vmem:[#allocation7 + $0x1] ss:$0 sm:$0xff]  ;;  %v100_v20 = vld [vmem:[#allocation5 + $0x178] sm:$0xff]  ;;  %v456_v23 = vld [vmem:[#allocation7 + $0x2] ss:$0 sm:$0xff] }
  0x48   :  { %633 = vmatprep.subr.bf16.mxu1 %v811_v1  ;;  %653 = vmatpush3.bf16.msra.mxu0 %v652_v36  ;;  %v457_v28 = vld [vmem:[#allocation7 + $0x3] ss:$0 sm:$0xff] }
  0x49   :  { %654 = vmatprep.subr.bf16.mxu0 %v811_v1 }
  0x4b   :  { %635 = vmatpush3.bf16.msra.mxu1 %v634_v18 }
  0x4c   :  { %636 = vmatprep.subr.bf16.mxu1 %v811_v1  ;;  %656 = vmatpush3.bf16.msra.mxu0 %v655_v39  ;;  %v420_v39 = vlaneseq }
  0x4d   :  { %657 = vmatprep.subr.bf16.mxu0 %v811_v1 }
  0x4e   :  { %v421_v40 = vand.u32 127, %v420_v39 }
  0x4f   :  { %638 = vmatpush3.bf16.msra.mxu1 %v637_v21  ;;  %v101_v21 = vld [vmem:[#allocation5 + $0x180] sm:$0xff] }
  0x50   :  { %639 = vmatprep.subr.bf16.mxu1 %v811_v1  ;;  %659 = vmatpush3.bf16.msra.mxu0 %v658_v42  ;;  %v691_v22 = vpack.c.bf16 %v101_v21, %v100_v20  ;;  %vm423_vm2 = vcmp.eq.s32.totalorder %v421_v40, 1  ;;  %vm422_vm3 = vcmp.eq.s32.totalorder %v421_v40, 0 }
  0x51   :  { %660 = vmatprep.subr.bf16.mxu0 %v811_v1 }
  0x53   :  { %641 = vmatpush3.bf16.msra.mxu1 %v640_v24 }
  0x54   :  { %642 = vmatprep.subr.bf16.mxu1 %v811_v1  ;;  %662 = vmatpush3.bf16.msra.mxu0 %v661_v45 }
  0x55   :  { %663 = vmatprep.subr.bf16.mxu0 %v811_v1 }
  0x57   :  { %644 = vmatpush3.bf16.msra.mxu1 %v643_v27 }
  0x58   :  { %669 = vmatprep.subr.bf16.mxu1 %v811_v1  ;;  %665 = vmatpush3.bf16.msra.mxu0 %v664_v48 }
  0x59   :  { %666 = vmatprep.subr.bf16.mxu0 %v811_v1 }
  0x5c   :  { %668 = vmatpush3.bf16.msra.mxu0 %v667_v56 }
 0x10d   :  { %v180_v50 = vpop.f32.mrb[0].mxu0 }
 0x10e   :  { %v181_v51 = vadd.f32 %v453_v49, %v180_v50  ;;  %v515_v52 = vpop.f32.mrb[1].mxu0 }
 0x110   :  { %v184_v53 = vmax.f32 %v181_v51, 0.0 }
 0x112   :  { %549 = vmatmul.mubr.f32.vlgmr.msra.gmra.mrb[0].mxu1 %v184_v53 }
 0x113   :  { %618 = vmatprep.mubr.msk.f32.mxu1 %vm810_vm0, %v809_v0  ;;  %671 = vmatpush3.bf16.msra.mxu1 %v670_v60  ;;  %v92_v0 = vld [vmem:[#allocation5 + $0x138] sm:$0xff] }
 0x114   :  { %672 = vmatprep.subr.bf16.mxu1 %v811_v1  ;;  %v679_v5 = vpack.c.bf16 %v93_v4, %v92_v0 }
 0x117   :  { %674 = vmatpush3.bf16.msra.mxu1 %v673_v62 }
 0x118   :  { %675 = vmatprep.subr.bf16.mxu1 %v811_v1 }
 0x11b   :  { %677 = vmatpush3.bf16.msra.mxu1 %v676_v3 }
 0x11c   :  { %678 = vmatprep.subr.bf16.mxu1 %v811_v1 }
 0x11f   :  { %680 = vmatpush3.bf16.msra.mxu1 %v679_v5 }
 0x120   :  { %681 = vmatprep.subr.bf16.mxu1 %v811_v1 }
 0x123   :  { %683 = vmatpush3.bf16.msra.mxu1 %v682_v8 }
 0x124   :  { %684 = vmatprep.subr.bf16.mxu1 %v811_v1 }
 0x127   :  { %686 = vmatpush3.bf16.msra.mxu1 %v685_v11 }
 0x128   :  { %687 = vmatprep.subr.bf16.mxu1 %v811_v1 }
 0x12b   :  { %689 = vmatpush3.bf16.msra.mxu1 %v688_v14 }
 0x12c   :  { %690 = vmatprep.subr.bf16.mxu1 %v811_v1 }
 0x12f   :  { %692 = vmatpush3.bf16.msra.mxu1 %v691_v22 }
 0x1e5   :  { %v255_v16 = vpop.f32.mrb[0].mxu1 }
 0x1e6   :  { %v256_v17 = vadd.f32 %v455_v15, %v255_v16  ;;  %v550_v18 = vpop.f32.mrb[1].mxu1 }
 0x1e8   :  { %v259_v19 = vmax.f32 %v256_v17, 0.0 }
 0x1ea   :  { %584 = vmatmul.mubr.f32.vlgmr.msra.gmra.mrb[2].mxu0 %v259_v19 }
 0x2bd   :  { %v330_v24 = vpop.f32.mrb[2].mxu0 }
 0x2be   :  { %v331_v25 = vadd.f32 %v456_v23, %v330_v24  ;;  %v585_v26 = vpop.f32.mrb[3].mxu0 }
 0x2c0   :  { %v334_v27 = vmax.f32 %v331_v25, 0.0 }
 0x2c2   :  { %619 = vmatmul.mubr.f32.vlgmr.msra.gmra.mrb[2].mxu1 %v334_v27 }
 0x395   :  { %v405_v29 = vpop.f32.mrb[2].mxu1 }
 0x396   :  { %v406_v30 = vadd.f32 %v457_v28, %v405_v29  ;;  %v620_v1 = vpop.f32.mrb[3].mxu1 }
 0x398   :  { %410 = vrot.lane.b32.xlu0 %v406_v30, %s812_s2 }
 0x40a   :  { %v411_v32 = vpop.permute.xlu0 %410 }
 0x40b   :  { %v413_v33 = vsub.f32 %v406_v30, %v411_v32 }
 0x40d   :  { %v414_v34 = vmul.f32 1.442695, %v413_v33 }
 0x40f   :  { %706 = vpow2.f32 %v414_v34 }
 0x419   :  { %v707_v35 = vpop.eup %706 }
 0x41a   :  { %v416_v36 = vadd.f32 1.0, %v707_v35 }
 0x41c   :  { %708 = vrcp.f32 %v416_v36 }
 0x426   :  { %v709_v37 = vpop.eup %708 }
 0x427   :  { %432 = vperm.xlu1 %705, %v709_v37   ;;  %v419_v38 = vsub.f32 1.0, %v709_v37 }
 0x429   :  { %426 = vperm.xlu0 %704, %v419_v38  }
 0x4a6   :  { %v433_v42 = vpop.permute.xlu1 %432 }
 0x4a8   :  { %v427_v41 = vpop.permute.xlu0 %426 }
 0x4a9   :  { %v429_v43 = vsel %vm423_vm2, %v427_v41, %v406_v30 }
 0x4aa   :  { %v435_v44 = vsel %vm422_vm3, %v433_v42, %v429_v43 }
 0x4ab   :  { %436 = vst.msk [vmem:[#allocation8] sm:$0xff] %vm110_vm1, %v435_v44 }
 0x4ac   :  { %787 = shalt.err (!%p784_p0)
}
 0x4ad   :  { %s788_s26 = scalar_lea.hbm %s921_s3, 128 }
 0x4ae   :  { %p789_p1 = scmp.ne.s32.totalorder %s921_s3, %s788_s26  ;;  %p792_p2 = scmp.lt.u32.totalorder %s788_s26, %s921_s3 }
 0x4b0   :  { %p794_p3 = pnand %p792_p2, %p789_p1 }
 0x4b2   :  { %797 = shalt.err (!%p794_p3)
}
 0x4b3   :  { %446 = dma.vmem_to_hbm [thread:$0]  %s444_s22, 128, %s921_s3, [#allocation4]  }
 0x4b4   :  { %802 = dma.done.wait [#allocation4], 128  }
 0x4b5   :  { %803 = vsyncadd [#allocation4], 4294967168 }
 0x4b6   :  { %450 = vsyncpa [#allocation3], 1 }
 0x4b7   :  { %451 = vsyncpa [#allocation6], 1 }
 0x4b8   :  { %452 = vsyncpa [#allocation4], 1 }

</bundles_post_ra>
